<compile_context>
chip_gen: v7x
topology: tpu7x:2x2x1
jax: 0.10.0
libtpu: 0.0.40
codegen_flags: <defaults>
</compile_context>

<pallas_src>
import functools

import jax
import jax.numpy as jnp
from jax import lax
from jax.experimental import pallas as pl
from jax.experimental.pallas import tpu as pltpu

LANE = 128          # TPU lane width; also the query-row block size and slab block width
SLAB_ROWS = 8       # sublane-aligned parameter slab height


def _attention_kernel(x1_ref, x2_ref, w_ref, out_ref, *, lx1, lx2, d, tq):
    x1 = x1_ref[...]                      # (tq, lx1)   — this grid step's query rows
    x2 = x2_ref[...]                      # (N2, lx2)   — resident across grid steps
    w = w_ref[...]                        # (8, 3*LANE) — packed parameter slab, resident
    d2 = 2 * d

    # Q projection padded to 2d columns; cols d:2d are exactly zero (zero weights/bias).
    q = (jnp.dot(x1, w[:lx1, 0:d2], preferred_element_type=jnp.float32)
         + w[lx1:lx1 + 1, 0:d2])                                        # (tq, 2d)

    # Fused K|V projection: one MXU op + one fused bias add. cols 0:d = K, d:2d = V.
    kv = (jnp.dot(x2, w[:lx2, LANE:LANE + d2], preferred_element_type=jnp.float32)
          + w[lx2:lx2 + 1, LANE:LANE + d2])                             # (N2, 2d)

    # scores = Q @ K^T: contract the padded q against kv — the zero columns of q kill
    # the V contribution exactly, and no k/v slice (hence no lane relayout) is needed.
    scores = lax.dot_general(q, kv, (((1,), (1,)), ((), ())),
                             preferred_element_type=jnp.float32)        # (tq, N2)

    # Numerically stable softmax with an exact divide (accuracy kept at f32).
    m = jnp.max(scores, axis=-1, keepdims=True)
    e = jnp.exp(scores - m)
    attn = e / jnp.sum(e, axis=-1, keepdims=True)

    # attention output + fc1(Identity) + ReLU, on the fused kv (no V slice).
    o = jnp.maximum(jnp.dot(attn, kv, preferred_element_type=jnp.float32), 0.0)  # (tq, 2d)

    # fc2, emitted transposed and lane-dense: out^T = W2_row · o^T + b2.
    # W2_row (slab row 0 of the fc2 block) has zeros in its first d entries, so the
    # relu(attn@K) columns of o contribute exactly nothing.
    out_t = lax.dot_general(w[0:1, 2 * LANE:2 * LANE + d2], o,
                            (((1,), (1,)), ((), ())),
                            preferred_element_type=jnp.float32)         # (1, tq)
    out_ref[...] = out_t + w[1:2, 2 * LANE:2 * LANE + tq]               # b2 lane-broadcast row


def pack_params(p):
    """Pack all Linear weights/biases into one (8, 3*LANE) slab, each logical block
    starting on a 128-lane boundary. Done once, off the hot path.

    Layout:
      cols   0:128  rows 0:lx1 = W_Q^T padded to 2d cols (cols d:2d zero), row lx1 = b_Q
      cols 128:256  rows 0:lx2 = [W_K^T | W_V^T], row lx2 = [b_K | b_V]
      cols 256:384  row 0 = fc2 weight row laid against the 2d cols of attn@kv
                            (first d entries zero, entries d:2d = W_2),
                    row 1 = b_2 broadcast across the full 128-lane block
    """
    wq, bq = p["wq"], p["bq"]
    wk, bk = p["wk"], p["bk"]
    wv, bv = p["wv"], p["bv"]
    w2, b2 = p["w2"], p["b2"]
    lx1, d = wq.shape
    lx2 = wk.shape[0]
    nout = w2.shape[1]
    assert nout == 1, "transposed lane-dense output path assumes ndim_out == 1"
    assert lx1 + 1 <= SLAB_ROWS and lx2 + 1 <= SLAB_ROWS and 2 <= SLAB_ROWS

    slab = jnp.zeros((SLAB_ROWS, 3 * LANE), jnp.float32)
    # Q block (cols d:2d stay zero on purpose).
    slab = slab.at[:lx1, 0:d].set(wq)
    slab = slab.at[lx1, 0:d].set(bq[0])
    # K|V block.
    slab = slab.at[:lx2, LANE:LANE + d].set(wk)
    slab = slab.at[:lx2, LANE + d:LANE + 2 * d].set(wv)
    slab = slab.at[lx2, LANE:LANE + d].set(bk[0])
    slab = slab.at[lx2, LANE + d:LANE + 2 * d].set(bv[0])
    # fc2 block.
    slab = slab.at[0, 2 * LANE + d:2 * LANE + 2 * d].set(w2[:, 0])
    slab = slab.at[1, 2 * LANE:3 * LANE].set(b2[0, 0])
    return slab


def simple_attention_approximator(x1, x2, w_packed, *, attn_dim=3, ndim_out=1, tq=LANE):
    n1, lx1 = x1.shape
    n2, lx2 = x2.shape
    assert ndim_out == 1
    assert tq == LANE and n1 % tq == 0, "query rows must be a multiple of 128"

    kernel = functools.partial(_attention_kernel, lx1=lx1, lx2=lx2, d=attn_dim, tq=tq)

    d2 = 2 * attn_dim
    cost = pl.CostEstimate(
        flops=int(2 * (n1 * lx1 * d2            # padded Q projection
                       + n2 * lx2 * d2          # fused K|V projection
                       + n1 * n2 * d2           # scores
                       + n1 * n2 * d2           # attn @ kv
                       + n1 * d2)),             # fc2 row matvec
        transcendentals=int(n1 * n2),           # exp
        bytes_accessed=int(4 * (x1.size + x2.size + w_packed.size + n1)),
    )

    out_row = pl.pallas_call(
        kernel,
        out_shape=jax.ShapeDtypeStruct((1, n1), jnp.float32),   # lane-dense transposed row
        grid=(n1 // tq,),
        in_specs=[
            pl.BlockSpec((tq, lx1), lambda i: (i, 0)),          # per-step query rows
            pl.BlockSpec(x2.shape, lambda i: (0, 0)),           # resident: DMA'd once
            pl.BlockSpec(w_packed.shape, lambda i: (0, 0)),     # resident: DMA'd once
        ],
        out_specs=pl.BlockSpec((1, tq), lambda i: (0, i)),
        compiler_params=pltpu.CompilerParams(
            dimension_semantics=("parallel",)),                 # shards across TCs on v7x
        cost_estimate=cost,
    )(x1, x2, w_packed)
    return out_row.reshape(n1, ndim_out)


def init_params(key, len_x1, len_x2, attn_dim=3, ndim_out=1):
    """Deterministic init mimicking torch.nn.Linear default (U(-1/sqrt(fan_in), ..))."""
    ks = jax.random.split(key, 8)

    def lin(kw, kb, fan_in, fan_out):
        bound = 1.0 / jnp.sqrt(jnp.float32(fan_in))
        # stored transposed relative to torch: (fan_in, fan_out) so forward does x @ W
        w = jax.random.uniform(kw, (fan_in, fan_out), jnp.float32, -bound, bound)
        b = jax.random.uniform(kb, (1, fan_out), jnp.float32, -bound, bound)
        return w, b

    wq, bq = lin(ks[0], ks[1], len_x1, attn_dim)
    wk, bk = lin(ks[2], ks[3], len_x2, attn_dim)
    wv, bv = lin(ks[4], ks[5], len_x2, attn_dim)
    w2, b2 = lin(ks[6], ks[7], attn_dim, ndim_out)
    return dict(wq=wq, bq=bq, wk=wk, bk=bk, wv=wv, bv=bv, w2=w2, b2=b2)


def reference_forward(x1, x2, p):
    hp = lax.Precision.HIGHEST
    q = jnp.dot(x1, p["wq"], precision=hp) + p["bq"]
    k = jnp.dot(x2, p["wk"], precision=hp) + p["bk"]
    v = jnp.dot(x2, p["wv"], precision=hp) + p["bv"]
    scores = jnp.dot(q, k.T, precision=hp)
    attn = jax.nn.softmax(scores, axis=-1)
    o = jnp.maximum(jnp.dot(attn, v, precision=hp), 0.0)
    return jnp.dot(o, p["w2"], precision=hp) + p["b2"]


if __name__ == "__main__":
    key = jax.random.PRNGKey(0)
    k_x1, k_x2, k_p = jax.random.split(key, 3)

    # Feature widths from the module (len_x1=7, len_x2=6). Row counts chosen
    # lane/sublane aligned (multiple of 128) so the grid, scores and output are lane-dense.
    len_x1, len_x2, n1, n2 = 7, 6, 256, 256
    x1 = jax.random.uniform(k_x1, (n1, len_x1), jnp.float32)
    x2 = jax.random.uniform(k_x2, (n2, len_x2), jnp.float32)
    params = init_params(k_p, len_x1, len_x2, attn_dim=3, ndim_out=1)
    w_packed = pack_params(params)   # packed once, outside the per-call hot path

    out = simple_attention_approximator(x1, x2, w_packed, attn_dim=3, ndim_out=1)
    out = jax.block_until_ready(out)

    ref = reference_forward(x1, x2, params)
    assert out.shape == (n1, 1)
    # Tight tolerance restored: kernel is f32 end-to-end with an exact softmax divide.
    assert jnp.allclose(out, ref, atol=1e-5, rtol=1e-5), "mismatch vs JAX reference"

    print("KERNEL_OK")
</pallas_src>

<mosaic_0001>
module attributes {stable_mosaic.version = 11 : i64} {
  func.func @_attention_kernel(%arg0: i32, %arg1: memref<128x7xf32, #tpu.memory_space<vmem>>, %arg2: memref<256x6xf32, #tpu.memory_space<vmem>>, %arg3: memref<8x384xf32, #tpu.memory_space<vmem>>, %arg4: memref<1x128xf32, #tpu.memory_space<vmem>>) attributes {dimension_semantics = [#tpu.dimension_semantics<parallel>], iteration_bounds = array<i64: 2>, scalar_prefetch = 0 : i64, scratch_operands = 0 : i64, tpu.core_type = #tpu.core_type<tc>, window_params = [{transform_indices = @transform_0, window_bounds = array<i64: 128, 7>}, {pipeline_mode = #tpu.pipeline_mode<synchronous>, transform_indices = @transform_1, window_bounds = array<i64: 256, 6>}, {pipeline_mode = #tpu.pipeline_mode<synchronous>, transform_indices = @transform_2, window_bounds = array<i64: 8, 384>}, {transform_indices = @transform_3, window_bounds = array<i64: 1, 128>}]} {
    %c0 = arith.constant 0 : index
    %c0_0 = arith.constant 0 : index
    %0 = vector.load %arg1[%c0, %c0_0] : memref<128x7xf32, #tpu.memory_space<vmem>>, vector<128x7xf32>
    %c0_1 = arith.constant 0 : index
    %c0_2 = arith.constant 0 : index
    %1 = vector.load %arg2[%c0_1, %c0_2] : memref<256x6xf32, #tpu.memory_space<vmem>>, vector<256x6xf32>
    %c0_3 = arith.constant 0 : index
    %c0_4 = arith.constant 0 : index
    %2 = vector.load %arg3[%c0_3, %c0_4] : memref<8x384xf32, #tpu.memory_space<vmem>>, vector<8x384xf32>
    %3 = vector.extract_strided_slice %2 {offsets = [0, 0], sizes = [7, 6], strides = [1, 1]} : vector<8x384xf32> to vector<7x6xf32>
    %cst = arith.constant dense<0.000000e+00> : vector<128x6xf32>
    %4 = tpu.matmul %0, %3, %cst {dimension_numbers = #tpu.dot_dimension_numbers<[1], [0], [0], [1], [0, 0, 1, 1], [], []>} : vector<128x7xf32>, vector<7x6xf32>, vector<128x6xf32> -> vector<128x6xf32>
    %5 = vector.extract_strided_slice %2 {offsets = [7, 0], sizes = [1, 6], strides = [1, 1]} : vector<8x384xf32> to vector<1x6xf32>
    %6 = vector.broadcast %5 : vector<1x6xf32> to vector<128x6xf32>
    %7 = arith.addf %4, %6 : vector<128x6xf32>
    %8 = vector.extract_strided_slice %2 {offsets = [0, 128], sizes = [6, 6], strides = [1, 1]} : vector<8x384xf32> to vector<6x6xf32>
    %cst_5 = arith.constant dense<0.000000e+00> : vector<256x6xf32>
    %9 = tpu.matmul %1, %8, %cst_5 {dimension_numbers = #tpu.dot_dimension_numbers<[1], [0], [0], [1], [0, 0, 1, 1], [], []>} : vector<256x6xf32>, vector<6x6xf32>, vector<256x6xf32> -> vector<256x6xf32>
    %10 = vector.extract_strided_slice %2 {offsets = [6, 128], sizes = [1, 6], strides = [1, 1]} : vector<8x384xf32> to vector<1x6xf32>
    %11 = vector.broadcast %10 : vector<1x6xf32> to vector<256x6xf32>
    %12 = arith.addf %9, %11 : vector<256x6xf32>
    %cst_6 = arith.constant dense<0.000000e+00> : vector<128x256xf32>
    %13 = tpu.matmul %7, %12, %cst_6 {dimension_numbers = #tpu.dot_dimension_numbers<[1], [1], [0], [0], [0, 0, 1, 0], [], []>} : vector<128x6xf32>, vector<256x6xf32>, vector<128x256xf32> -> vector<128x256xf32>
    %cst_7 = arith.constant dense<0xFF800000> : vector<128xf32>
    %14 = vector.multi_reduction <maximumf>, %13, %cst_7 [1] : vector<128x256xf32> to vector<128xf32>
    %15 = vector.shape_cast %14 : vector<128xf32> to vector<128x1xf32>
    %16 = vector.broadcast %15 : vector<128x1xf32> to vector<128x256xf32>
    %17 = arith.subf %13, %16 : vector<128x256xf32>
    %18 = math.exp %17 : vector<128x256xf32>
    %cst_8 = arith.constant dense<0.000000e+00> : vector<128xf32>
    %19 = vector.multi_reduction <add>, %18, %cst_8 [1] : vector<128x256xf32> to vector<128xf32>
    %20 = vector.shape_cast %19 : vector<128xf32> to vector<128x1xf32>
    %21 = vector.broadcast %20 : vector<128x1xf32> to vector<128x256xf32>
    %22 = arith.divf %18, %21 : vector<128x256xf32>
    %cst_9 = arith.constant dense<0.000000e+00> : vector<128x6xf32>
    %23 = tpu.matmul %22, %12, %cst_9 {dimension_numbers = #tpu.dot_dimension_numbers<[1], [0], [0], [1], [0, 0, 1, 1], [], []>} : vector<128x256xf32>, vector<256x6xf32>, vector<128x6xf32> -> vector<128x6xf32>
    %cst_10 = arith.constant 0.000000e+00 : f32
    %24 = vector.broadcast %cst_10 : f32 to vector<128x6xf32>
    %25 = arith.maximumf %23, %24 : vector<128x6xf32>
    %26 = vector.extract_strided_slice %2 {offsets = [0, 256], sizes = [1, 6], strides = [1, 1]} : vector<8x384xf32> to vector<1x6xf32>
    %cst_11 = arith.constant dense<0.000000e+00> : vector<1x128xf32>
    %27 = tpu.matmul %26, %25, %cst_11 {dimension_numbers = #tpu.dot_dimension_numbers<[1], [1], [0], [0], [0, 0, 1, 0], [], []>} : vector<1x6xf32>, vector<128x6xf32>, vector<1x128xf32> -> vector<1x128xf32>
    %28 = vector.extract_strided_slice %2 {offsets = [1, 256], sizes = [1, 128], strides = [1, 1]} : vector<8x384xf32> to vector<1x128xf32>
    %29 = arith.addf %27, %28 : vector<1x128xf32>
    %c0_12 = arith.constant 0 : index
    %c0_13 = arith.constant 0 : index
    %30 = vector.load %arg4[%c0_12, %c0_13] : memref<1x128xf32, #tpu.memory_space<vmem>>, vector<1x128xf32>
    tpu.vector_store %arg4[%c0_12, %c0_13], %29 {strides = array<i32>} : memref<1x128xf32, #tpu.memory_space<vmem>>, vector<1x128xf32>,
    return
  }
  func.func @transform_0(%arg0: i32) -> (i32, i32) {
    %c0_i32 = arith.constant 0 : i32
    %c0_i32_0 = arith.constant 0 : i32
    return %arg0, %c0_i32 : i32, i32
  }
  func.func @transform_1(%arg0: i32) -> (i32, i32) {
    %c0_i32 = arith.constant 0 : i32
    %c0_i32_0 = arith.constant 0 : i32
    %c0_i32_1 = arith.constant 0 : i32
    return %c0_i32, %c0_i32_0 : i32, i32
  }
  func.func @transform_2(%arg0: i32) -> (i32, i32) {
    %c0_i32 = arith.constant 0 : i32
    %c0_i32_0 = arith.constant 0 : i32
    %c0_i32_1 = arith.constant 0 : i32
    return %c0_i32, %c0_i32_0 : i32, i32
  }
  func.func @transform_3(%arg0: i32) -> (i32, i32) {
    %c0_i32 = arith.constant 0 : i32
    %c0_i32_0 = arith.constant 0 : i32
    return %c0_i32, %arg0 : i32, i32
  }
}

</mosaic_0001>

<bundles_post_ra>
// kernel: tpu_custom_call.1
= control target key start
LH: loop header
LB: loop body
LE: loop exit
PB: predicated region body
PF: predicated region fallthrough
CT: control target
= control target key end

     0   :  { %8 = vsyncpa [#allocation3], 0  ;;  %s3214_s0 = inlined_call_operand.vmem [shape: f32[256,7], index: 0, kind: input, shape index: {}]   ;;  %s3215_s1 = inlined_call_operand.vmem [shape: f32[256,6], index: 1, kind: input, shape index: {}]   ;;  %s3216_s2 = inlined_call_operand.vmem [shape: f32[8,384], index: 2, kind: input, shape index: {}]   ;;  %s3217_s3 = inlined_call_operand.hbm [shape: f32[1,256], index: 3, kind: output, shape index: {}]  }
   0x1   :  { %10 = vsyncpa [#allocation3 + $0x1], 0  ;;  %s2435_s12 = smov 0   ;;  %s2437_s13 = smov 0  }
   0x2   :  { %s2439_s14 = smov 0   ;;  %s2441_s15 = smov 0  }
   0x3 LB: > { %s1650_s16 = sadd.s32 4294967295, %s2409_s15   ;;  %s1651_s17 = sadd.s32 4294967294, %s2409_s15   ;;  %s2409_s15 = sphi %s2441_s15, %s3225_s15   ;;  %s2405_s14 = sphi %s2439_s14, %s3224_s14   ;;  %s2401_s13 = sphi %s2437_s13, %s3223_s13   ;;  %s2397_s12 = sphi %s2435_s12, %s3222_s12  }
   0x4   : > { %s2458_s18 = sadd.s32 1, %s2409_s15   ;;  %s91_s19 = sadd.s32 1, %s2405_s14 }
   0x5   : > { %s88_s20 = ssub.s32 %s2409_s15, %s2458_s18  ;;  %p101_p0 = scmp.ne.s32.totalorder %s2405_s14, %s2401_s13 }
   0x6   : > { %p89_p1 = scmp.eq.s32.totalorder %s88_s20, 0  ;;  %p102_p2 = scmp.eq.s32.totalorder %s1650_s16, 1 }
   0x7   : > { %p107_p3 = scmp.ne.s32.totalorder %s2401_s13, %s2397_s12  ;;  %p108_p4 = scmp.eq.s32.totalorder %s1651_s17, 1 }
   0x8   : > { %s2468_s21 = scalar_select %p89_p1, %s2405_s14, %s91_s19  }
   0x9   : > { %p2470_p5 = por %p102_p2, %p101_p0  ;;  %p2474_p6 = por %p108_p4, %p107_p3 }
   0xa   : > { %p1654_p7 = scmp.ge.s32.totalorder %s2409_s15, 1  ;;  %p141_p8 = scmp.lt.s32.totalorder %s2409_s15, 3 }
   0xc   : > { %p142_p9 = pnand %p1654_p7, %p141_p8 }
   0xd   : > { %v2483_v0 = vld [vmem:[%s3216_s2 + $0x8] sm:$0xff] (!%p142_p9)  ;;  %vm524_vm0 = vcmask (!%p142_p9), 1045504   ;;  %v186_v1 = vld [vmem:[%s3215_s1] sm:$0xff] (!%p142_p9)  ;;  %vm427_vm1 = vcmask (!%p142_p9), 48128   ;;  %v188_v3 = vld [vmem:[%s3215_s1 + $0x10] sm:$0xff] (!%p142_p9)  ;;  %s2496_s5 = sshll.u32 (!%p142_p9), %s1650_s16, 4  ;;  %v221_v50 = vlaneseq (!%p142_p9) }
   0xe   : > { %145 = sbr.rel (%p142_p9) target bundleno = 1374 (0x55e), region = 32  ;;  %v187_v2 = vld [vmem:[%s3215_s1 + $0x8] sm:$0xff] (!%p142_p9)  ;;  %2012 = vmatprep.subr.msk.mxu1 (!%p142_p9), %vm524_vm0, %v2483_v0  ;;  %2014 = vmatprep.mubr.msk.f32.mxu1 (!%p142_p9), %vm427_vm1, %v186_v1  ;;  %p165_p10 = scmp.lt.s32.totalorder (!%p142_p9), %s2496_s5, 31  ;;  %v189_v4 = vld [vmem:[%s3215_s1 + $0x18] sm:$0xff] (!%p142_p9)  ;;  %v190_v5 = vld [vmem:[%s3215_s1 + $0x20] sm:$0xff] (!%p142_p9)  ;;  %vm274_vm2 = vcmask (!%p142_p9), 1046528  }
   0xf   : > { %2013 = vmatpush3.msk.msra.mxu1 (!%p142_p9), %vm524_vm0, %v2483_v0  ;;  %v191_v6 = vld [vmem:[%s3215_s1 + $0x28] sm:$0xff] (!%p142_p9)  ;;  %v192_v7 = vld [vmem:[%s3215_s1 + $0x30] sm:$0xff] (!%p142_p9)  ;;  %vm225_vm3 = vcmask (!%p142_p9), 56320   ;;  %v2526_v8 = vld [vmem:[%s3216_s2] sm:$0xff] (!%p142_p9)  ;;  %v222_v51 = vshrl.u32 (!%p142_p9), %v221_v50, 7  ;;  %vm2412_vm5 = vmmov (!%p142_p9), 0   ;;  %s3172_s7 = scalar_lea.hbm (!%p142_p9), %s3217_s3, %s2496_s5 }
  0x10   : > { %2015 = vmatmul.mubr.msk.f32.vlgmr.msra.gmra.mrb[0].mxu1 (!%p142_p9), %vm427_vm1, %v187_v2  ;;  %v193_v11 = vld [vmem:[%s3215_s1 + $0x38] sm:$0xff] (!%p142_p9)  ;;  %1986 = vmatprep.subr.msk.mxu0 (!%p142_p9), %vm274_vm2, %v2526_v8  ;;  %v194_v13 = vld [vmem:[%s3215_s1 + $0x40] sm:$0xff] (!%p142_p9)  ;;  %v195_v15 = vld [vmem:[%s3215_s1 + $0x48] sm:$0xff] (!%p142_p9)  ;;  %s2414_s10 = smov (!%p142_p9), [#allocation2]  }
  0x11   : > { %2017 = vmatprep.mubr.msk.f32.mxu1 (!%p142_p9), %vm427_vm1, %v188_v3  ;;  %1987 = vmatpush3.msk.msra.mxu0 (!%p142_p9), %vm274_vm2, %v2526_v8  ;;  %v196_v17 = vld [vmem:[%s3215_s1 + $0x50] sm:$0xff] (!%p142_p9)  ;;  %v197_v19 = vld [vmem:[%s3215_s1 + $0x58] sm:$0xff] (!%p142_p9)  ;;  %v198_v21 = vld [vmem:[%s3215_s1 + $0x60] sm:$0xff] (!%p142_p9)  ;;  %v425_v52 = vsub.s32 (!%p142_p9), 6, %v222_v51  ;;  %v223_v58 = vsub.s32 (!%p142_p9), 7, %v222_v51 }
  0x12   : > { %v199_v23 = vld [vmem:[%s3215_s1 + $0x68] sm:$0xff] (!%p142_p9)  ;;  %v200_v25 = vld [vmem:[%s3215_s1 + $0x70] sm:$0xff] (!%p142_p9)  ;;  %v201_v27 = vld [vmem:[%s3215_s1 + $0x78] sm:$0xff] (!%p142_p9) }
  0x13   : > { %v202_v29 = vld [vmem:[%s3215_s1 + $0x80] sm:$0xff] (!%p142_p9)  ;;  %v203_v31 = vld [vmem:[%s3215_s1 + $0x88] sm:$0xff] (!%p142_p9)  ;;  %v204_v33 = vld [vmem:[%s3215_s1 + $0x90] sm:$0xff] (!%p142_p9)  ;;  %v2664_v53 = vrot.slane (!%p142_p9), %v2483_v0, %v425_v52  ;;  %v2673_v1 = vrot.slane (!%p142_p9), %v2526_v8, %v223_v58 }
  0x14   : > { %2018 = vmatmul.mubr.msk.f32.gmra.mrb[2].mxu1 (!%p142_p9), %vm427_vm1, %v189_v4  ;;  %v205_v35 = vld [vmem:[%s3215_s1 + $0x98] sm:$0xff] (!%p142_p9)  ;;  %v206_v37 = vld [vmem:[%s3215_s1 + $0xa0] sm:$0xff] (!%p142_p9)  ;;  %v207_v39 = vld [vmem:[%s3215_s1 + $0xa8] sm:$0xff] (!%p142_p9) }
  0x15   : > { %s166_s8 = scalar_select %p165_p10, %s2496_s5, 31  ;;  %2020 = vmatprep.mubr.msk.f32.mxu1 %vm427_vm1, %v190_v5  ;;  %v208_v40 = vld [vmem:[%s3215_s1 + $0xb0] sm:$0xff]  ;;  %v209_v41 = vld [vmem:[%s3215_s1 + $0xb8] sm:$0xff]  ;;  %v210_v42 = vld [vmem:[%s3215_s1 + $0xc0] sm:$0xff] }
  0x16   : > { %v211_v43 = vld [vmem:[%s3215_s1 + $0xc8] sm:$0xff]  ;;  %v212_v44 = vld [vmem:[%s3215_s1 + $0xd0] sm:$0xff]  ;;  %v213_v45 = vld [vmem:[%s3215_s1 + $0xd8] sm:$0xff] }
  0x17   : > { %s1656_s11 = sshll.u32 %s166_s8, 3  ;;  %v214_v46 = vld [vmem:[%s3215_s1 + $0xe0] sm:$0xff]  ;;  %v215_v47 = vld [vmem:[%s3215_s1 + $0xe8] sm:$0xff]  ;;  %v216_v48 = vld [vmem:[%s3215_s1 + $0xf0] sm:$0xff] }
  0x18   : > { %s2517_s24 = scalar_lea.vmem %s3214_s0, %s1656_s11  ;;  %2021 = vmatmul.mubr.msk.f32.gmra.mrb[4].mxu1 %vm427_vm1, %v191_v6  ;;  %v217_v49 = vld [vmem:[%s3215_s1 + $0xf8] sm:$0xff]  ;;  %vm2743_vm4 = vmpackc.low %vm427_vm1, %vm427_vm1  ;;  %s2351_s11 = sshll.u32 %s2414_s10, 4  ;;  %s2352_s11 = int_to_ptr.vmem [resolvable:$false] %s2351_s11 }
  0x19   : > { %v170_v9 = vld [vmem:[%s2517_s24] sm:$0xff]  ;;  %v171_v10 = vld [vmem:[%s2517_s24 + $0x8] sm:$0xff]  ;;  %2023 = vmatprep.mubr.msk.f32.mxu1 %vm427_vm1, %v192_v7  ;;  %v172_v12 = vld [vmem:[%s2517_s24 + $0x10] sm:$0xff]  ;;  %s2353_s16 = scalar_lea.vmem %s2352_s11, 32 }
  0x1a   : > { %1988 = vmatprep.mubr.msk.f32.mxu0 %vm225_vm3, %v170_v9  ;;  %v173_v14 = vld [vmem:[%s2517_s24 + $0x18] sm:$0xff]  ;;  %v174_v16 = vld [vmem:[%s2517_s24 + $0x20] sm:$0xff]  ;;  %v175_v18 = vld [vmem:[%s2517_s24 + $0x28] sm:$0xff] }
  0x1b   : > { %1989 = vmatmul.mubr.msk.f32.vlgmr.msra.gmra.mrb[0].mxu0 %vm225_vm3, %v171_v10  ;;  %v176_v20 = vld [vmem:[%s2517_s24 + $0x30] sm:$0xff]  ;;  %v177_v22 = vld [vmem:[%s2517_s24 + $0x38] sm:$0xff]  ;;  %v178_v24 = vld [vmem:[%s2517_s24 + $0x40] sm:$0xff] }
  0x1c   : > { %2024 = vmatmul.mubr.msk.f32.gmra.mrb[6].mxu1 %vm427_vm1, %v193_v11  ;;  %1991 = vmatprep.mubr.msk.f32.mxu0 %vm225_vm3, %v172_v12  ;;  %v179_v26 = vld [vmem:[%s2517_s24 + $0x48] sm:$0xff]  ;;  %v180_v28 = vld [vmem:[%s2517_s24 + $0x50] sm:$0xff]  ;;  %v181_v30 = vld [vmem:[%s2517_s24 + $0x58] sm:$0xff] }
  0x1d   : > { %2026 = vmatprep.mubr.msk.f32.mxu1 %vm427_vm1, %v194_v13  ;;  %v182_v32 = vld [vmem:[%s2517_s24 + $0x60] sm:$0xff]  ;;  %v183_v34 = vld [vmem:[%s2517_s24 + $0x68] sm:$0xff]  ;;  %v184_v36 = vld [vmem:[%s2517_s24 + $0x70] sm:$0xff] }
  0x1e   : > { %v185_v38 = vld [vmem:[%s2517_s24 + $0x78] sm:$0xff]  ;;  %s162_s24 = sand.u32 1, %s2401_s13  }
  0x1f   : > { %1992 = vmatmul.mubr.msk.f32.gmra.mrb[2].mxu0 %vm225_vm3, %v173_v14  ;;  %s163_s29 = scalar_lea.vmem [#allocation2], %s162_s24  ;;  %s1584_s8 = scalar_lea.sflag [#allocation3], %s162_s24 }
  0x20   : > { %2027 = vmatmul.mubr.msk.f32.gmra.mrb[8].mxu1 %vm427_vm1, %v195_v15  ;;  %1994 = vmatprep.mubr.msk.f32.mxu0 %vm225_vm3, %v174_v16  ;;  %s1596_s30 = sshll.u32 %s163_s29, 4  ;;  %s3174_s30 = int_to_ptr.vmem [resolvable:$true] %s1596_s30 }
  0x21   : > { %2029 = vmatprep.mubr.msk.f32.mxu1 %vm427_vm1, %v196_v17  ;;  %s2347_s9 = scalar_lea.vmem %s3174_s30, 16  ;;  %p2354_p0 = scmp.lt.s32.totalorder %s3174_s30, %s2352_s11 }
  0x22   : > { %p2348_p11 = scmp.ne.s32.totalorder %s3174_s30, %s2347_s9  ;;  %p2355_p1 = scmp.lt.s32.totalorder %s2353_s16, %s2347_s9 }
  0x23   : > { %1995 = vmatmul.mubr.msk.f32.gmra.mrb[4].mxu0 %vm225_vm3, %v175_v18 }
  0x24   : > { %2030 = vmatmul.mubr.msk.f32.gmra.mrb[10].mxu1 %vm427_vm1, %v197_v19  ;;  %1997 = vmatprep.mubr.msk.f32.mxu0 %vm225_vm3, %v176_v20  ;;  %p2349_p12 = pnand %p2348_p11, %p2470_p5  ;;  %p2356_p2 = por %p2355_p1, %p2354_p0 }
  0x25   : > { %2032 = vmatprep.mubr.msk.f32.mxu1 %vm427_vm1, %v198_v21 }
  0x26   : > { %p2350_p13 = pneg %p2349_p12 }
  0x27   : > { %1998 = vmatmul.mubr.msk.f32.gmra.mrb[6].mxu0 %vm225_vm3, %v177_v22 }
  0x28   : > { %2033 = vmatmul.mubr.msk.f32.gmra.mrb[12].mxu1 %vm427_vm1, %v199_v23  ;;  %2000 = vmatprep.mubr.msk.f32.mxu0 %vm225_vm3, %v178_v24  ;;  %p2357_p3 = pnand %p2356_p2, %p2350_p13 }
  0x29   : > { %2035 = vmatprep.mubr.msk.f32.mxu1 %vm427_vm1, %v200_v25 }
  0x2b   : > { %2001 = vmatmul.mubr.msk.f32.gmra.mrb[8].mxu0 %vm225_vm3, %v179_v26 }
  0x2c   : > { %2036 = vmatmul.mubr.msk.f32.gmra.mrb[14].mxu1 %vm427_vm1, %v201_v27  ;;  %2003 = vmatprep.mubr.msk.f32.mxu0 %vm225_vm3, %v180_v28 }
  0x2d   : > { %2038 = vmatprep.mubr.msk.f32.mxu1 %vm427_vm1, %v202_v29 }
  0x2f   : > { %2004 = vmatmul.mubr.msk.f32.gmra.mrb[10].mxu0 %vm225_vm3, %v181_v30 }
  0x30   : > { %2039 = vmatmul.mubr.msk.f32.gmra.mrb[16].mxu1 %vm427_vm1, %v203_v31  ;;  %2006 = vmatprep.mubr.msk.f32.mxu0 %vm225_vm3, %v182_v32 }
  0x31   : > { %2041 = vmatprep.mubr.msk.f32.mxu1 %vm427_vm1, %v204_v33 }
  0x33   : > { %2007 = vmatmul.mubr.msk.f32.gmra.mrb[12].mxu0 %vm225_vm3, %v183_v34 }
  0x34   : > { %2042 = vmatmul.mubr.msk.f32.gmra.mrb[18].mxu1 %vm427_vm1, %v205_v35  ;;  %2009 = vmatprep.mubr.msk.f32.mxu0 %vm225_vm3, %v184_v36 }
  0x35   : > { %2044 = vmatprep.mubr.msk.f32.mxu1 %vm427_vm1, %v206_v37 }
  0x37   : > { %2010 = vmatmul.mubr.msk.f32.gmra.mrb[14].mxu0 %vm225_vm3, %v185_v38 }
  0x38   : > { %2045 = vmatmul.mubr.msk.f32.gmra.mrb[20].mxu1 %vm427_vm1, %v207_v39 }
  0x39   : > { %2047 = vmatprep.mubr.msk.f32.mxu1 %vm427_vm1, %v208_v40 }
  0x3c   : > { %2048 = vmatmul.mubr.msk.f32.gmra.mrb[22].mxu1 %vm427_vm1, %v209_v41 }
  0x3d   : > { %2050 = vmatprep.mubr.msk.f32.mxu1 %vm427_vm1, %v210_v42 }
  0x40   : > { %2051 = vmatmul.mubr.msk.f32.gmra.mrb[24].mxu1 %vm427_vm1, %v211_v43 }
  0x41   : > { %2053 = vmatprep.mubr.msk.f32.mxu1 %vm427_vm1, %v212_v44 }
  0x44   : > { %2054 = vmatmul.mubr.msk.f32.gmra.mrb[26].mxu1 %vm427_vm1, %v213_v45 }
  0x45   : > { %2056 = vmatprep.mubr.msk.f32.mxu1 %vm427_vm1, %v214_v46 }
  0x48   : > { %2057 = vmatmul.mubr.msk.f32.gmra.mrb[28].mxu1 %vm427_vm1, %v215_v47 }
  0x49   : > { %2059 = vmatprep.mubr.msk.f32.mxu1 %vm427_vm1, %v216_v48 }
  0x4c   : > { %2060 = vmatmul.mubr.msk.f32.gmra.mrb[30].mxu1 %vm427_vm1, %v217_v49 }
  0xe3   : > { %v2016_v54 = vpop.f32.mrb[0].mxu1 }
  0xe4   : > { %v600_v55 = vadd.f32 %v2016_v54, %v2664_v53  ;;  %v594_v56 = vpop.f32.mrb[1].mxu1 }
  0xe5   : > { %v595_v57 = vadd.f32 %v594_v56, %v2664_v53 }
  0xe7   : > { %v2668_v59 = vpack.c.bf16 %v600_v55, %v595_v57  ;;  %v2019_v60 = vpop.f32.mrb[2].mxu1 }
  0xe8   : > { %v610_v61 = vadd.f32 %v2019_v60, %v2664_v53  ;;  %v604_v62 = vpop.f32.mrb[3].mxu1 }
  0xe9   : > { %v605_v63 = vadd.f32 %v604_v62, %v2664_v53 }
  0xeb   : > { %v2675_v0 = vpack.c.bf16 %v610_v61, %v605_v63  ;;  %v2022_v2 = vpop.f32.mrb[4].mxu1 }
  0xec   : > { %v620_v3 = vadd.f32 %v2022_v2, %v2664_v53  ;;  %v614_v4 = vpop.f32.mrb[5].mxu1 }
  0xed   : > { %v615_v5 = vadd.f32 %v614_v4, %v2664_v53 }
  0xee   : > { %v1990_v6 = vpop.f32.mrb[0].mxu0 }
  0xef   : > { %v2679_v7 = vpack.c.bf16 %v620_v3, %v615_v5  ;;  %v2025_v9 = vpop.f32.mrb[6].mxu1  ;;  %v2682_v10 = vadd.f32 %v1990_v6, %v2673_v1  ;;  %v344_v11 = vpop.f32.mrb[1].mxu0 }
  0xf0   : > { %v630_v12 = vadd.f32 %v2025_v9, %v2664_v53  ;;  %v624_v8 = vpop.f32.mrb[7].mxu1  ;;  %v2686_v13 = vadd.f32 %v344_v11, %v2673_v1 }
  0xf1   : > { %v625_v14 = vadd.f32 %v624_v8, %v2664_v53 }
  0xf2   : > { %1857 = vmatprep.mubr.msk.f32.mxu0 %vm427_vm1, %v2686_v13  ;;  %v1993_v15 = vpop.f32.mrb[2].mxu0 }
  0xf3   : > { %v2691_v16 = vpack.c.bf16 %v630_v12, %v625_v14  ;;  %v2028_v17 = vpop.f32.mrb[8].mxu1  ;;  %v2694_v18 = vadd.f32 %v1993_v15, %v2673_v1  ;;  %v354_v19 = vpop.f32.mrb[3].mxu0 }
  0xf4   : > { %v640_v20 = vadd.f32 %v2028_v17, %v2664_v53  ;;  %v634_v21 = vpop.f32.mrb[9].mxu1  ;;  %v2698_v22 = vadd.f32 %v354_v19, %v2673_v1 }
  0xf5   : > { %v635_v23 = vadd.f32 %v634_v21, %v2664_v53 }
  0xf6   : > { %v1996_v24 = vpop.f32.mrb[4].mxu0 }
  0xf7   : > { %v2701_v25 = vpack.c.bf16 %v640_v20, %v635_v23  ;;  %v2031_v26 = vpop.f32.mrb[10].mxu1  ;;  %v2704_v27 = vadd.f32 %v1996_v24, %v2673_v1  ;;  %v364_v28 = vpop.f32.mrb[5].mxu0 }
  0xf8   : > { %v650_v29 = vadd.f32 %v2031_v26, %v2664_v53  ;;  %v644_v30 = vpop.f32.mrb[11].mxu1  ;;  %v2708_v31 = vadd.f32 %v364_v28, %v2673_v1 }
  0xf9   : > { %v645_v32 = vadd.f32 %v644_v30, %v2664_v53 }
  0xfa   : > { %v1999_v33 = vpop.f32.mrb[6].mxu0 }
  0xfb   : > { %v2711_v34 = vpack.c.bf16 %v650_v29, %v645_v32  ;;  %v2034_v35 = vpop.f32.mrb[12].mxu1  ;;  %v2714_v36 = vadd.f32 %v1999_v33, %v2673_v1  ;;  %v374_v37 = vpop.f32.mrb[7].mxu0 }
  0xfc   : > { %v660_v38 = vadd.f32 %v2034_v35, %v2664_v53  ;;  %v654_v39 = vpop.f32.mrb[13].mxu1  ;;  %v2718_v40 = vadd.f32 %v374_v37, %v2673_v1 }
  0xfd   : > { %v655_v41 = vadd.f32 %v654_v39, %v2664_v53 }
  0xfe   : > { %v2002_v42 = vpop.f32.mrb[8].mxu0 }
  0xff   : > { %v2721_v43 = vpack.c.bf16 %v660_v38, %v655_v41  ;;  %v2037_v44 = vpop.f32.mrb[14].mxu1  ;;  %v2724_v45 = vadd.f32 %v2002_v42, %v2673_v1  ;;  %v384_v46 = vpop.f32.mrb[9].mxu0 }
 0x100   : > { %v670_v47 = vadd.f32 %v2037_v44, %v2664_v53  ;;  %v664_v48 = vpop.f32.mrb[15].mxu1  ;;  %v2728_v49 = vadd.f32 %v384_v46, %v2673_v1 }
 0x101   : > { %v665_v50 = vadd.f32 %v664_v48, %v2664_v53 }
 0x102   : > { %v2005_v51 = vpop.f32.mrb[10].mxu0 }
 0x103   : > { %v2731_v52 = vpack.c.bf16 %v670_v47, %v665_v50  ;;  %v2040_v54 = vpop.f32.mrb[16].mxu1  ;;  %v2734_v55 = vadd.f32 %v2005_v51, %v2673_v1  ;;  %v394_v56 = vpop.f32.mrb[11].mxu0 }
 0x104   : > { %v680_v57 = vadd.f32 %v2040_v54, %v2664_v53  ;;  %v674_v58 = vpop.f32.mrb[17].mxu1  ;;  %v2738_v60 = vadd.f32 %v394_v56, %v2673_v1 }
 0x105   : > { %v675_v61 = vadd.f32 %v674_v58, %v2664_v53 }
 0x106   : > { %v2008_v63 = vpop.f32.mrb[12].mxu0 }
 0x107   : > { %v2097_v2 = vpack.c.bf16 %v680_v57, %v675_v61  ;;  %v2043_v3 = vpop.f32.mrb[18].mxu1  ;;  %v2748_v4 = vadd.f32 %v2008_v63, %v2673_v1  ;;  %v404_v5 = vpop.f32.mrb[13].mxu0 }
 0x108   : > { %v690_v6 = vadd.f32 %v2043_v3, %v2664_v53  ;;  %v684_v9 = vpop.f32.mrb[19].mxu1  ;;  %v2752_v11 = vadd.f32 %v404_v5, %v2673_v1 }
 0x109   : > { %v685_v12 = vadd.f32 %v684_v9, %v2664_v53  ;;  %2099 = vmatprep.subr.msk.bf16.mxu0 %vm2743_vm4, %v2097_v2  ;;  %2146 = vmatprep.subr.bf16.mxu1 %v2097_v2 }
 0x10a   : > { %2102 = vmatpush3.bf16.xpose.msk.msra.mxu0 %vm2743_vm4, %v2668_v59  ;;  %2148 = vmatpush3.bf16.msra.mxu1 %v2668_v59  ;;  %v2011_v8 = vpop.f32.mrb[14].mxu0 }
 0x10b   : > { %v2103_v14 = vpack.c.bf16 %v690_v6, %v685_v12  ;;  %v2046_v15 = vpop.f32.mrb[20].mxu1  ;;  %v2762_v17 = vadd.f32 %v2011_v8, %v2673_v1  ;;  %v414_v19 = vpop.f32.mrb[15].mxu0 }
 0x10c   : > { %v700_v20 = vadd.f32 %v2046_v15, %v2664_v53  ;;  %v694_v21 = vpop.f32.mrb[21].mxu1  ;;  %v2766_v23 = vadd.f32 %v414_v19, %v2673_v1 }
 0x10d   : > { %v695_v24 = vadd.f32 %v694_v21, %v2664_v53  ;;  %2150 = vmatprep.subr.bf16.mxu1 %v2103_v14  ;;  %2105 = vmatprep.subr.msk.bf16.mxu0 %vm2743_vm4, %v2103_v14 }
 0x10e   : > { %2152 = vmatpush3.bf16.msra.mxu1 %v2675_v0 }
 0x10f   : > { %v2109_v59 = vpack.c.bf16 %v700_v20, %v695_v24  ;;  %v2049_v26 = vpop.f32.mrb[22].mxu1 }
 0x110   : > { %v710_v28 = vadd.f32 %v2049_v26, %v2664_v53  ;;  %v704_v29 = vpop.f32.mrb[23].mxu1 }
 0x111   : > { %v705_v30 = vadd.f32 %v704_v29, %v2664_v53  ;;  %2154 = vmatprep.subr.bf16.mxu1 %v2109_v59 }
 0x112   : > { %2108 = vmatpush3.bf16.xpose.msk.msra.mxu0 %vm2743_vm4, %v2675_v0  ;;  %2156 = vmatpush3.bf16.msra.mxu1 %v2679_v7 }
 0x113   : > { %v2115_v1 = vpack.c.bf16 %v710_v28, %v705_v30  ;;  %v2052_v32 = vpop.f32.mrb[24].mxu1  ;;  %2111 = vmatprep.subr.msk.bf16.mxu0 %vm2743_vm4, %v2109_v59 }
 0x114   : > { %v720_v33 = vadd.f32 %v2052_v32, %v2664_v53  ;;  %v714_v35 = vpop.f32.mrb[25].mxu1 }
 0x115   : > { %v715_v37 = vadd.f32 %v714_v35, %v2664_v53  ;;  %2158 = vmatprep.subr.bf16.mxu1 %v2115_v1 }
 0x116   : > { %2160 = vmatpush3.bf16.msra.mxu1 %v2691_v16 }
 0x117   : > { %v2121_v38 = vpack.c.bf16 %v720_v33, %v715_v37  ;;  %v2055_v39 = vpop.f32.mrb[26].mxu1 }
 0x118   : > { %v730_v41 = vadd.f32 %v2055_v39, %v2664_v53  ;;  %v724_v0 = vpop.f32.mrb[27].mxu1 }
 0x119   : > { %v725_v42 = vadd.f32 %v724_v0, %v2664_v53  ;;  %2162 = vmatprep.subr.bf16.mxu1 %v2121_v38 }
 0x11a   : > { %2114 = vmatpush3.bf16.xpose.msk.msra.mxu0 %vm2743_vm4, %v2679_v7  ;;  %2164 = vmatpush3.bf16.msra.mxu1 %v2701_v25 }
 0x11b   : > { %v2127_v44 = vpack.c.bf16 %v730_v41, %v725_v42  ;;  %v2058_v46 = vpop.f32.mrb[28].mxu1  ;;  %2117 = vmatprep.subr.msk.bf16.mxu0 %vm2743_vm4, %v2115_v1 }
 0x11c   : > { %v740_v47 = vadd.f32 %v2058_v46, %v2664_v53  ;;  %v734_v48 = vpop.f32.mrb[29].mxu1 }
 0x11d   : > { %v735_v50 = vadd.f32 %v734_v48, %v2664_v53  ;;  %2166 = vmatprep.subr.bf16.mxu1 %v2127_v44 }
 0x11e   : > { %2168 = vmatpush3.bf16.msra.mxu1 %v2711_v34 }
 0x11f   : > { %v2133_v51 = vpack.c.bf16 %v740_v47, %v735_v50  ;;  %v2061_v54 = vpop.f32.mrb[30].mxu1 }
 0x120   : > { %v750_v56 = vadd.f32 %v2061_v54, %v2664_v53  ;;  %v744_v7 = vpop.f32.mrb[31].mxu1 }
 0x121   : > { %v745_v57 = vadd.f32 %v744_v7, %v2664_v53  ;;  %2170 = vmatprep.subr.bf16.mxu1 %v2133_v51 }
 0x122   : > { %2120 = vmatpush3.bf16.xpose.msk.msra.mxu0 %vm2743_vm4, %v2691_v16  ;;  %2172 = vmatpush3.bf16.msra.mxu1 %v2721_v43 }
 0x123   : > { %v2139_v58 = vpack.c.bf16 %v750_v56, %v745_v57  ;;  %2123 = vmatprep.subr.msk.bf16.mxu0 %vm2743_vm4, %v2121_v38 }
 0x125   : > { %2174 = vmatprep.subr.bf16.mxu1 %v2139_v58 }
 0x126   : > { %2176 = vmatpush3.bf16.msra.mxu1 %v2731_v52 }
 0x12a   : > { %2126 = vmatpush3.bf16.xpose.msk.msra.mxu0 %vm2743_vm4, %v2701_v25 }
 0x12b   : > { %2129 = vmatprep.subr.msk.bf16.mxu0 %vm2743_vm4, %v2127_v44 }
 0x132   : > { %2132 = vmatpush3.bf16.xpose.msk.msra.mxu0 %vm2743_vm4, %v2711_v34 }
 0x133   : > { %2135 = vmatprep.subr.msk.bf16.mxu0 %vm2743_vm4, %v2133_v51 }
 0x13a   : > { %2138 = vmatpush3.bf16.xpose.msk.msra.mxu0 %vm2743_vm4, %v2721_v43 }
 0x13b   : > { %2141 = vmatprep.subr.msk.bf16.mxu0 %vm2743_vm4, %v2139_v58 }
 0x142   : > { %2144 = vmatpush3.bf16.xpose.msk.msra.mxu0 %vm2743_vm4, %v2731_v52 }
 0x149   : > { %1858 = vmatmul.mubr.msk.f32.vlgmr.msra.gmra.mrb[16].mxu0 %vm427_vm1, %v2686_v13 }
 0x14a   : > { %1859 = vmatprep.mubr.msk.f32.mxu0 %vm427_vm1, %v2682_v10 }
 0x14d   : > { %1860 = vmatmul.mubr.msk.f32.gmra.mrb[18].mxu0 %vm427_vm1, %v2682_v10 }
 0x14e   : > { %1861 = vmatprep.mubr.msk.f32.mxu0 %vm427_vm1, %v2698_v22 }
 0x151   : > { %1862 = vmatmul.mubr.msk.f32.gmra.mrb[20].mxu0 %vm427_vm1, %v2698_v22 }
 0x152   : > { %1863 = vmatprep.mubr.msk.f32.mxu0 %vm427_vm1, %v2694_v18 }
 0x155   : > { %1864 = vmatmul.mubr.msk.f32.gmra.mrb[22].mxu0 %vm427_vm1, %v2694_v18 }
 0x156   : > { %1865 = vmatprep.mubr.msk.f32.mxu0 %vm427_vm1, %v2708_v31 }
 0x159   : > { %1866 = vmatmul.mubr.msk.f32.gmra.mrb[24].mxu0 %vm427_vm1, %v2708_v31 }
 0x15a   : > { %1867 = vmatprep.mubr.msk.f32.mxu0 %vm427_vm1, %v2704_v27 }
 0x15d   : > { %1868 = vmatmul.mubr.msk.f32.gmra.mrb[26].mxu0 %vm427_vm1, %v2704_v27 }
 0x15e   : > { %1869 = vmatprep.mubr.msk.f32.mxu0 %vm427_vm1, %v2718_v40 }
 0x161   : > { %1870 = vmatmul.mubr.msk.f32.gmra.mrb[28].mxu0 %vm427_vm1, %v2718_v40 }
 0x162   : > { %1871 = vmatprep.mubr.msk.f32.mxu0 %vm427_vm1, %v2714_v36 }
 0x165   : > { %1872 = vmatmul.mubr.msk.f32.gmra.mrb[30].mxu0 %vm427_vm1, %v2714_v36 }
 0x166   : > { %1873 = vmatprep.mubr.msk.f32.mxu0 %vm427_vm1, %v2728_v49 }
 0x169   : > { %1874 = vmatmul.mubr.msk.f32.gmra.mrb[32].mxu0 %vm427_vm1, %v2728_v49 }
 0x16a   : > { %1875 = vmatprep.mubr.msk.f32.mxu0 %vm427_vm1, %v2724_v45 }
 0x16d   : > { %1876 = vmatmul.mubr.msk.f32.gmra.mrb[34].mxu0 %vm427_vm1, %v2724_v45 }
 0x16e   : > { %1877 = vmatprep.mubr.msk.f32.mxu0 %vm427_vm1, %v2738_v60 }
 0x171   : > { %1878 = vmatmul.mubr.msk.f32.gmra.mrb[36].mxu0 %vm427_vm1, %v2738_v60 }
 0x172   : > { %1879 = vmatprep.mubr.msk.f32.mxu0 %vm427_vm1, %v2734_v55 }
 0x175   : > { %1880 = vmatmul.mubr.msk.f32.gmra.mrb[38].mxu0 %vm427_vm1, %v2734_v55 }
 0x176   : > { %1881 = vmatprep.mubr.msk.f32.mxu0 %vm427_vm1, %v2752_v11 }
 0x179   : > { %1882 = vmatmul.mubr.msk.f32.gmra.mrb[40].mxu0 %vm427_vm1, %v2752_v11 }
 0x17a   : > { %1883 = vmatprep.mubr.msk.f32.mxu0 %vm427_vm1, %v2748_v4 }
 0x17d   : > { %1884 = vmatmul.mubr.msk.f32.gmra.mrb[42].mxu0 %vm427_vm1, %v2748_v4 }
 0x17e   : > { %1885 = vmatprep.mubr.msk.f32.mxu0 %vm427_vm1, %v2766_v23 }
 0x181   : > { %1886 = vmatmul.mubr.msk.f32.gmra.mrb[44].mxu0 %vm427_vm1, %v2766_v23 }
 0x182   : > { %1887 = vmatprep.mubr.msk.f32.mxu0 %vm427_vm1, %v2762_v17 }
 0x185   : > { %1888 = vmatmul.mubr.msk.f32.gmra.mrb[46].mxu0 %vm427_vm1, %v2762_v17 }
 0x21c   : > { %v2883_v53 = vpop.f32.mrb[16].mxu0 }
 0x21d   : > { %v2885_v10 = vpop.f32.mrb[17].mxu0 }
 0x21e   : > { %v1058_v13 = vmax.f32 %v2883_v53, %v2885_v10 }
 0x220   : > { %1059 = vmax.xlane.f32.xlu0 %v1058_v13  ;;  %v2889_v16 = vpop.f32.mrb[18].mxu0 }
 0x221   : > { %v2891_v18 = vpop.f32.mrb[19].mxu0 }
 0x222   : > { %v1061_v22 = vmax.f32 %v2889_v16, %v2891_v18 }
 0x224   : > { %1062 = vmax.xlane.f32.xlu0 %v1061_v22  ;;  %v2895_v25 = vpop.f32.mrb[20].mxu0 }
 0x225   : > { %v2897_v27 = vpop.f32.mrb[21].mxu0 }
 0x226   : > { %v1064_v31 = vmax.f32 %v2895_v25, %v2897_v27 }
 0x228   : > { %1065 = vmax.xlane.f32.xlu1 %v1064_v31  ;;  %v2901_v34 = vpop.f32.mrb[22].mxu0 }
 0x229   : > { %v2903_v36 = vpop.f32.mrb[23].mxu0 }
 0x22a   : > { %v1067_v40 = vmax.f32 %v2901_v34, %v2903_v36 }
 0x22c   : > { %1068 = vmax.xlane.f32.xlu1 %v1067_v40  ;;  %v2907_v43 = vpop.f32.mrb[24].mxu0 }
 0x22d   : > { %v2909_v45 = vpop.f32.mrb[25].mxu0 }
 0x22e   : > { %v1070_v49 = vmax.f32 %v2907_v43, %v2909_v45 }
 0x230   : > { %1071 = vmax.xlane.f32.xlu0 %v1070_v49  ;;  %v2913_v52 = vpop.f32.mrb[26].mxu0 }
 0x231   : > { %v2915_v55 = vpop.f32.mrb[27].mxu0 }
 0x232   : > { %v1073_v60 = vmax.f32 %v2913_v52, %v2915_v55 }
 0x234   : > { %1074 = vmax.xlane.f32.xlu1 %v1073_v60  ;;  %v2919_v61 = vpop.f32.mrb[28].mxu0 }
 0x235   : > { %v2921_v63 = vpop.f32.mrb[29].mxu0 }
 0x236   : > { %v1076_v2 = vmax.f32 %v2919_v61, %v2921_v63 }
 0x238   : > { %1077 = vmax.xlane.f32.xlu0 %v1076_v2  ;;  %v2925_v3 = vpop.f32.mrb[30].mxu0 }
 0x239   : > { %v2927_v4 = vpop.f32.mrb[31].mxu0 }
 0x23a   : > { %v1079_v5 = vmax.f32 %v2925_v3, %v2927_v4 }
 0x23c   : > { %1080 = vmax.xlane.f32.xlu1 %v1079_v5  ;;  %v2931_v6 = vpop.f32.mrb[32].mxu0 }
 0x23d   : > { %v2933_v9 = vpop.f32.mrb[33].mxu0 }
 0x23e   : > { %v1082_v11 = vmax.f32 %v2931_v6, %v2933_v9 }
 0x240   : > { %1083 = vmax.xlane.f32.xlu0 %v1082_v11  ;;  %v2937_v12 = vpop.f32.mrb[34].mxu0 }
 0x241   : > { %v2939_v8 = vpop.f32.mrb[35].mxu0 }
 0x242   : > { %v1085_v14 = vmax.f32 %v2937_v12, %v2939_v8 }
 0x244   : > { %1086 = vmax.xlane.f32.xlu1 %v1085_v14  ;;  %v2943_v15 = vpop.f32.mrb[36].mxu0 }
 0x245   : > { %v2945_v17 = vpop.f32.mrb[37].mxu0 }
 0x246   : > { %v1088_v19 = vmax.f32 %v2943_v15, %v2945_v17 }
 0x248   : > { %1089 = vmax.xlane.f32.xlu0 %v1088_v19  ;;  %v2949_v20 = vpop.f32.mrb[38].mxu0 }
 0x249   : > { %v2951_v21 = vpop.f32.mrb[39].mxu0 }
 0x24a   : > { %v1091_v23 = vmax.f32 %v2949_v20, %v2951_v21 }
 0x24c   : > { %1092 = vmax.xlane.f32.xlu1 %v1091_v23  ;;  %v2955_v24 = vpop.f32.mrb[40].mxu0 }
 0x24d   : > { %v2957_v59 = vpop.f32.mrb[41].mxu0 }
 0x24e   : > { %v1094_v26 = vmax.f32 %v2955_v24, %v2957_v59 }
 0x250   : > { %1095 = vmax.xlane.f32.xlu0 %v1094_v26  ;;  %v2961_v28 = vpop.f32.mrb[42].mxu0 }
 0x251   : > { %v2963_v29 = vpop.f32.mrb[43].mxu0 }
 0x252   : > { %v1097_v30 = vmax.f32 %v2961_v28, %v2963_v29 }
 0x254   : > { %1098 = vmax.xlane.f32.xlu1 %v1097_v30  ;;  %v2967_v1 = vpop.f32.mrb[44].mxu0 }
 0x255   : > { %v2969_v32 = vpop.f32.mrb[45].mxu0 }
 0x256   : > { %v1100_v33 = vmax.f32 %v2967_v1, %v2969_v32 }
 0x258   : > { %1101 = vmax.xlane.f32.xlu0 %v1100_v33  ;;  %v2973_v35 = vpop.f32.mrb[46].mxu0 }
 0x259   : > { %v2975_v37 = vpop.f32.mrb[47].mxu0 }
 0x25a   : > { %v1103_v38 = vmax.f32 %v2973_v35, %v2975_v37 }
 0x25c   : > { %1104 = vmax.xlane.f32.xlu1 %v1103_v38 }
 0x2ad   : > { %v1060_v39 = vpop.xlane.xlu0 %1059 }
 0x2ae   : > { %v1106_v41 = vsub.f32 %v2883_v53, %v1060_v39  ;;  %v1107_v0 = vsub.f32 %v2885_v10, %v1060_v39 }
 0x2b0   : > { %v1138_v42 = vmul.f32 1.442695, %v1106_v41  ;;  %v1140_v44 = vmul.f32 1.442695, %v1107_v0 }
 0x2b1   : > { %v1063_v46 = vpop.xlane.xlu0 %1062 }
 0x2b2   : > { %2251 = vpow2.f32 %v1138_v42  ;;  %v1108_v47 = vsub.f32 %v2889_v16, %v1063_v46  ;;  %v1109_v48 = vsub.f32 %v2891_v18, %v1063_v46 }
 0x2b3   : > { %2253 = vpow2.f32 %v1140_v44 }
 0x2b4   : > { %v1142_v50 = vmul.f32 1.442695, %v1108_v47  ;;  %v1144_v51 = vmul.f32 1.442695, %v1109_v48 }
 0x2b5   : > { %v1066_v54 = vpop.xlane.xlu1 %1065 }
 0x2b6   : > { %2255 = vpow2.f32 %v1142_v50  ;;  %v1110_v56 = vsub.f32 %v2895_v25, %v1066_v54  ;;  %v1111_v7 = vsub.f32 %v2897_v27, %v1066_v54 }
 0x2b7   : > { %2257 = vpow2.f32 %v1144_v51 }
 0x2b8   : > { %v1146_v57 = vmul.f32 1.442695, %v1110_v56  ;;  %v1148_v58 = vmul.f32 1.442695, %v1111_v7 }
 0x2b9   : > { %v1069_v53 = vpop.xlane.xlu1 %1068 }
 0x2ba   : > { %2259 = vpow2.f32 %v1146_v57  ;;  %v1112_v10 = vsub.f32 %v2901_v34, %v1069_v53  ;;  %v1113_v13 = vsub.f32 %v2903_v36, %v1069_v53 }
 0x2bb   : > { %2261 = vpow2.f32 %v1148_v58 }
 0x2bc   : > { %v2987_v16 = vpop.eup %2251  ;;  %v1150_v18 = vmul.f32 1.442695, %v1112_v10  ;;  %v1152_v22 = vmul.f32 1.442695, %v1113_v13 }
 0x2bd   : > { %v2989_v31 = vpop.eup %2253  ;;  %v1072_v40 = vpop.xlane.xlu0 %1071 }
 0x2be   : > { %2263 = vpow2.f32 %v1150_v18  ;;  %v1114_v25 = vsub.f32 %v2907_v43, %v1072_v40  ;;  %v1115_v27 = vsub.f32 %v2909_v45, %v1072_v40  ;;  %v1202_v49 = vadd.f32 %v2989_v31, %v2987_v16 }
 0x2bf   : > { %2265 = vpow2.f32 %v1152_v22 }
 0x2c0   : > { %v2995_v34 = vpop.eup %2255  ;;  %v1154_v36 = vmul.f32 1.442695, %v1114_v25  ;;  %v1156_v60 = vmul.f32 1.442695, %v1115_v27  ;;  %1203 = vadd.xlane.f32.xlu0 %v1202_v49 }
 0x2c1   : > { %v2997_v2 = vpop.eup %2257  ;;  %v1075_v5 = vpop.xlane.xlu1 %1074 }
 0x2c2   : > { %2267 = vpow2.f32 %v1154_v36  ;;  %v1116_v11 = vsub.f32 %v2913_v52, %v1075_v5  ;;  %v1117_v14 = vsub.f32 %v2915_v55, %v1075_v5  ;;  %v1205_v43 = vadd.f32 %v2997_v2, %v2995_v34 }
 0x2c3   : > { %2269 = vpow2.f32 %v1156_v60 }
 0x2c4   : > { %v3003_v45 = vpop.eup %2259  ;;  %v1158_v19 = vmul.f32 1.442695, %v1116_v11  ;;  %v1160_v23 = vmul.f32 1.442695, %v1117_v14  ;;  %1206 = vadd.xlane.f32.xlu1 %v1205_v43 }
 0x2c5   : > { %v3005_v26 = vpop.eup %2261  ;;  %v1078_v30 = vpop.xlane.xlu0 %1077 }
 0x2c6   : > { %2271 = vpow2.f32 %v1158_v19  ;;  %v1118_v33 = vsub.f32 %v2919_v61, %v1078_v30  ;;  %v1119_v38 = vsub.f32 %v2921_v63, %v1078_v30  ;;  %v1208_v52 = vadd.f32 %v3005_v26, %v3003_v45 }
 0x2c7   : > { %2273 = vpow2.f32 %v1160_v23 }
 0x2c8   : > { %v3011_v55 = vpop.eup %2263  ;;  %v1162_v39 = vmul.f32 1.442695, %v1118_v33  ;;  %v1164_v41 = vmul.f32 1.442695, %v1119_v38  ;;  %1209 = vadd.xlane.f32.xlu0 %v1208_v52 }
 0x2c9   : > { %v3013_v0 = vpop.eup %2265  ;;  %v1081_v42 = vpop.xlane.xlu1 %1080 }
 0x2ca   : > { %2275 = vpow2.f32 %v1162_v39  ;;  %v1120_v44 = vsub.f32 %v2925_v3, %v1081_v42  ;;  %v1121_v46 = vsub.f32 %v2927_v4, %v1081_v42  ;;  %v1211_v61 = vadd.f32 %v3013_v0, %v3011_v55 }
 0x2cb   : > { %2277 = vpow2.f32 %v1164_v41 }
 0x2cc   : > { %v3019_v63 = vpop.eup %2267  ;;  %v1166_v47 = vmul.f32 1.442695, %v1120_v44  ;;  %v1168_v48 = vmul.f32 1.442695, %v1121_v46  ;;  %1212 = vadd.xlane.f32.xlu1 %v1211_v61 }
 0x2cd   : > { %v3021_v50 = vpop.eup %2269  ;;  %v1084_v51 = vpop.xlane.xlu0 %1083 }
 0x2ce   : > { %2279 = vpow2.f32 %v1166_v47  ;;  %v1122_v54 = vsub.f32 %v2931_v6, %v1084_v51  ;;  %v1123_v56 = vsub.f32 %v2933_v9, %v1084_v51  ;;  %v1214_v3 = vadd.f32 %v3021_v50, %v3019_v63 }
 0x2cf   : > { %2281 = vpow2.f32 %v1168_v48 }
 0x2d0   : > { %v3027_v4 = vpop.eup %2271  ;;  %v1170_v7 = vmul.f32 1.442695, %v1122_v54  ;;  %v1172_v57 = vmul.f32 1.442695, %v1123_v56  ;;  %1215 = vadd.xlane.f32.xlu0 %v1214_v3 }
 0x2d1   : > { %v3029_v58 = vpop.eup %2273  ;;  %v1087_v53 = vpop.xlane.xlu1 %1086 }
 0x2d2   : > { %2283 = vpow2.f32 %v1170_v7  ;;  %v1124_v10 = vsub.f32 %v2937_v12, %v1087_v53  ;;  %v1125_v13 = vsub.f32 %v2939_v8, %v1087_v53  ;;  %v1217_v6 = vadd.f32 %v3029_v58, %v3027_v4 }
 0x2d3   : > { %2285 = vpow2.f32 %v1172_v57 }
 0x2d4   : > { %v3035_v9 = vpop.eup %2275  ;;  %v1174_v18 = vmul.f32 1.442695, %v1124_v10  ;;  %v1176_v22 = vmul.f32 1.442695, %v1125_v13  ;;  %1218 = vadd.xlane.f32.xlu1 %v1217_v6 }
 0x2d5   : > { %v3037_v40 = vpop.eup %2277  ;;  %v1090_v25 = vpop.xlane.xlu0 %1089 }
 0x2d6   : > { %2287 = vpow2.f32 %v1174_v18  ;;  %v1126_v27 = vsub.f32 %v2943_v15, %v1090_v25  ;;  %v1127_v49 = vsub.f32 %v2945_v17, %v1090_v25  ;;  %v1220_v12 = vadd.f32 %v3037_v40, %v3035_v9 }
 0x2d7   : > { %2289 = vpow2.f32 %v1176_v22 }
 0x2d8   : > { %v3043_v8 = vpop.eup %2279  ;;  %v1178_v36 = vmul.f32 1.442695, %v1126_v27  ;;  %v1180_v60 = vmul.f32 1.442695, %v1127_v49  ;;  %1221 = vadd.xlane.f32.xlu0 %v1220_v12 }
 0x2d9   : > { %v3045_v5 = vpop.eup %2281  ;;  %v1093_v11 = vpop.xlane.xlu1 %1092 }
 0x2da   : > { %2291 = vpow2.f32 %v1178_v36  ;;  %v1128_v14 = vsub.f32 %v2949_v20, %v1093_v11  ;;  %v1129_v43 = vsub.f32 %v2951_v21, %v1093_v11  ;;  %v1223_v15 = vadd.f32 %v3045_v5, %v3043_v8 }
 0x2db   : > { %2293 = vpow2.f32 %v1180_v60 }
 0x2dc   : > { %v3051_v17 = vpop.eup %2283  ;;  %v1182_v19 = vmul.f32 1.442695, %v1128_v14  ;;  %v1184_v23 = vmul.f32 1.442695, %v1129_v43  ;;  %1224 = vadd.xlane.f32.xlu1 %v1223_v15 }
 0x2dd   : > { %v3053_v30 = vpop.eup %2285  ;;  %v1096_v33 = vpop.xlane.xlu0 %1095 }
 0x2de   : > { %2295 = vpow2.f32 %v1182_v19  ;;  %v1130_v38 = vsub.f32 %v2955_v24, %v1096_v33  ;;  %v1131_v52 = vsub.f32 %v2957_v59, %v1096_v33  ;;  %v1226_v20 = vadd.f32 %v3053_v30, %v3051_v17 }
 0x2df   : > { %2297 = vpow2.f32 %v1184_v23 }
 0x2e0   : > { %v3059_v21 = vpop.eup %2287  ;;  %v1186_v39 = vmul.f32 1.442695, %v1130_v38  ;;  %v1188_v41 = vmul.f32 1.442695, %v1131_v52  ;;  %1227 = vadd.xlane.f32.xlu0 %v1226_v20 }
 0x2e1   : > { %v3061_v42 = vpop.eup %2289  ;;  %v1099_v44 = vpop.xlane.xlu1 %1098 }
 0x2e2   : > { %2299 = vpow2.f32 %v1186_v39  ;;  %v1132_v46 = vsub.f32 %v2961_v28, %v1099_v44  ;;  %v1133_v61 = vsub.f32 %v2963_v29, %v1099_v44  ;;  %v1229_v24 = vadd.f32 %v3061_v42, %v3059_v21 }
 0x2e3   : > { %2301 = vpow2.f32 %v1188_v41 }
 0x2e4   : > { %v3067_v59 = vpop.eup %2291  ;;  %v1190_v47 = vmul.f32 1.442695, %v1132_v46  ;;  %v1192_v48 = vmul.f32 1.442695, %v1133_v61  ;;  %1230 = vadd.xlane.f32.xlu1 %v1229_v24 }
 0x2e5   : > { %v3069_v51 = vpop.eup %2293  ;;  %v1102_v54 = vpop.xlane.xlu0 %1101 }
 0x2e6   : > { %2303 = vpow2.f32 %v1190_v47  ;;  %v1134_v56 = vsub.f32 %v2967_v1, %v1102_v54  ;;  %v1135_v3 = vsub.f32 %v2969_v32, %v1102_v54  ;;  %v1232_v28 = vadd.f32 %v3069_v51, %v3067_v59 }
 0x2e7   : > { %2305 = vpow2.f32 %v1192_v48 }
 0x2e8   : > { %v3075_v29 = vpop.eup %2295  ;;  %v1194_v7 = vmul.f32 1.442695, %v1134_v56  ;;  %v1196_v57 = vmul.f32 1.442695, %v1135_v3  ;;  %1233 = vadd.xlane.f32.xlu0 %v1232_v28 }
 0x2e9   : > { %v3077_v53 = vpop.eup %2297  ;;  %v1105_v10 = vpop.xlane.xlu1 %1104 }
 0x2ea   : > { %2307 = vpow2.f32 %v1194_v7  ;;  %v1136_v13 = vsub.f32 %v2973_v35, %v1105_v10  ;;  %v1137_v6 = vsub.f32 %v2975_v37, %v1105_v10  ;;  %v1235_v1 = vadd.f32 %v3077_v53, %v3075_v29 }
 0x2eb   : > { %2309 = vpow2.f32 %v1196_v57 }
 0x2ec   : > { %v3083_v32 = vpop.eup %2299  ;;  %v1198_v18 = vmul.f32 1.442695, %v1136_v13  ;;  %v1200_v22 = vmul.f32 1.442695, %v1137_v6  ;;  %1236 = vadd.xlane.f32.xlu1 %v1235_v1 }
 0x2ed   : > { %v3085_v25 = vpop.eup %2301 }
 0x2ee   : > { %2311 = vpow2.f32 %v1198_v18  ;;  %v1238_v27 = vadd.f32 %v3085_v25, %v3083_v32 }
 0x2ef   : > { %2313 = vpow2.f32 %v1200_v22 }
 0x2f0   : > { %v3089_v49 = vpop.eup %2303  ;;  %1239 = vadd.xlane.f32.xlu0 %v1238_v27 }
 0x2f1   : > { %v3091_v35 = vpop.eup %2305 }
 0x2f2   : > { %v1241_v37 = vadd.f32 %v3091_v35, %v3089_v49 }
 0x2f4   : > { %v3095_v12 = vpop.eup %2307  ;;  %1242 = vadd.xlane.f32.xlu1 %v1241_v37 }
 0x2f5   : > { %v3097_v36 = vpop.eup %2309 }
 0x2f6   : > { %v1244_v60 = vadd.f32 %v3097_v36, %v3095_v12 }
 0x2f8   : > { %v3101_v11 = vpop.eup %2311  ;;  %1245 = vadd.xlane.f32.xlu0 %v1244_v60 }
 0x2f9   : > { %v3103_v14 = vpop.eup %2313 }
 0x2fa   : > { %v1247_v43 = vadd.f32 %v3103_v14, %v3101_v11 }
 0x2fc   : > { %1248 = vadd.xlane.f32.xlu1 %v1247_v43 }
 0x34d   : > { %v1204_v15 = vpop.xlane.xlu0 %1203 }
 0x34e   : > { %2315 = vrcp.f32 %v1204_v15 }
 0x351   : > { %v1207_v19 = vpop.xlane.xlu1 %1206 }
 0x352   : > { %2317 = vrcp.f32 %v1207_v19 }
 0x355   : > { %v1210_v23 = vpop.xlane.xlu0 %1209 }
 0x356   : > { %2319 = vrcp.f32 %v1210_v23 }
 0x358   : > { %v2316_v33 = vpop.eup %2315 }
 0x359   : > { %v1251_v38 = vmul.f32 %v2316_v33, %v2987_v16  ;;  %v1213_v52 = vpop.xlane.xlu1 %1212  ;;  %v1252_v20 = vmul.f32 %v2316_v33, %v2989_v31 }
 0x35a   : > { %2321 = vrcp.f32 %v1213_v52 }
 0x35b   : > { %1362 = vmatprep.mubr.f32.mxu1 %v1252_v20 }
 0x35c   : > { %v2318_v39 = vpop.eup %2317  ;;  %1363 = vmatmul.mubr.f32.vlgmr.msra.gmra.mrb[32].mxu1 %v1251_v38 }
 0x35d   : > { %v1216_v41 = vpop.xlane.xlu0 %1215  ;;  %v1255_v44 = vmul.f32 %v2318_v39, %v2997_v2  ;;  %v1254_v46 = vmul.f32 %v2318_v39, %v2995_v34  ;;  %v2411_v39 = vmov 0.0|0.0  }
 0x35e   : > { %2323 = vrcp.f32 %v1216_v41  ;;  %2177 = vmatprep.subr.bf16.mxu0 %v2411_v39 }
 0x35f   : > { %1367 = vmatprep.mubr.f32.mxu1 %v1255_v44 }
 0x360   : > { %v2320_v61 = vpop.eup %2319  ;;  %1368 = vmatmul.mubr.f32.gmra.mrb[34].mxu1 %v1254_v46 }
 0x361   : > { %v1219_v24 = vpop.xlane.xlu1 %1218  ;;  %v1258_v47 = vmul.f32 %v2320_v61, %v3005_v26  ;;  %v1257_v16 = vmul.f32 %v2320_v61, %v3003_v45 }
 0x362   : > { %2325 = vrcp.f32 %v1219_v24 }
 0x363   : > { %1372 = vmatprep.mubr.f32.mxu1 %v1258_v47 }
 0x364   : > { %v2322_v31 = vpop.eup %2321  ;;  %1373 = vmatmul.mubr.f32.gmra.mrb[36].mxu1 %v1257_v16 }
 0x365   : > { %v1222_v48 = vpop.xlane.xlu0 %1221  ;;  %v1261_v54 = vmul.f32 %v2322_v31, %v3013_v0  ;;  %v1260_v2 = vmul.f32 %v2322_v31, %v3011_v55 }
 0x366   : > { %2327 = vrcp.f32 %v1222_v48 }
 0x367   : > { %1377 = vmatprep.mubr.f32.mxu1 %v1261_v54 }
 0x368   : > { %v2324_v34 = vpop.eup %2323  ;;  %1378 = vmatmul.mubr.f32.gmra.mrb[38].mxu1 %v1260_v2 }
 0x369   : > { %v1225_v56 = vpop.xlane.xlu1 %1224  ;;  %v1264_v3 = vmul.f32 %v2324_v34, %v3021_v50  ;;  %v1263_v26 = vmul.f32 %v2324_v34, %v3019_v63 }
 0x36a   : > { %2329 = vrcp.f32 %v1225_v56 }
 0x36b   : > { %1382 = vmatprep.mubr.f32.mxu1 %v1264_v3 }
 0x36c   : > { %v2326_v45 = vpop.eup %2325  ;;  %1383 = vmatmul.mubr.f32.gmra.mrb[40].mxu1 %v1263_v26 }
 0x36d   : > { %v1228_v28 = vpop.xlane.xlu0 %1227  ;;  %v1267_v7 = vmul.f32 %v2326_v45, %v3029_v58  ;;  %v1266_v0 = vmul.f32 %v2326_v45, %v3027_v4 }
 0x36e   : > { %2331 = vrcp.f32 %v1228_v28 }
 0x36f   : > { %1387 = vmatprep.mubr.f32.mxu1 %v1267_v7 }
 0x370   : > { %v2328_v55 = vpop.eup %2327  ;;  %1388 = vmatmul.mubr.f32.gmra.mrb[42].mxu1 %v1266_v0 }
 0x371   : > { %v1231_v57 = vpop.xlane.xlu1 %1230  ;;  %v1270_v10 = vmul.f32 %v2328_v55, %v3037_v40  ;;  %v1269_v50 = vmul.f32 %v2328_v55, %v3035_v9 }
 0x372   : > { %2333 = vrcp.f32 %v1231_v57 }
 0x373   : > { %1392 = vmatprep.mubr.f32.mxu1 %v1270_v10 }
 0x374   : > { %v2330_v63 = vpop.eup %2329  ;;  %1393 = vmatmul.mubr.f32.gmra.mrb[44].mxu1 %v1269_v50 }
 0x375   : > { %v1234_v13 = vpop.xlane.xlu0 %1233  ;;  %v1273_v6 = vmul.f32 %v2330_v63, %v3045_v5  ;;  %v1272_v58 = vmul.f32 %v2330_v63, %v3043_v8 }
 0x376   : > { %2335 = vrcp.f32 %v1234_v13 }
 0x377   : > { %1397 = vmatprep.mubr.f32.mxu1 %v1273_v6 }
 0x378   : > { %v2332_v4 = vpop.eup %2331  ;;  %1398 = vmatmul.mubr.f32.gmra.mrb[46].mxu1 %v1272_v58 }
 0x379   : > { %v1237_v1 = vpop.xlane.xlu1 %1236  ;;  %v1276_v18 = vmul.f32 %v2332_v4, %v3053_v30  ;;  %v1275_v40 = vmul.f32 %v2332_v4, %v3051_v17 }
 0x37a   : > { %2337 = vrcp.f32 %v1237_v1 }
 0x37b   : > { %1402 = vmatprep.mubr.f32.mxu1 %v1276_v18 }
 0x37c   : > { %v2334_v9 = vpop.eup %2333  ;;  %1403 = vmatmul.mubr.f32.gmra.mrb[48].mxu1 %v1275_v40 }
 0x37d   : > { %v1240_v22 = vpop.xlane.xlu0 %1239  ;;  %v1279_v27 = vmul.f32 %v2334_v9, %v3061_v42  ;;  %v1278_v5 = vmul.f32 %v2334_v9, %v3059_v21 }
 0x37e   : > { %2339 = vrcp.f32 %v1240_v22 }
 0x37f   : > { %1407 = vmatprep.mubr.f32.mxu1 %v1279_v27 }
 0x380   : > { %v2336_v8 = vpop.eup %2335  ;;  %1408 = vmatmul.mubr.f32.gmra.mrb[50].mxu1 %v1278_v5 }
 0x381   : > { %v1243_v37 = vpop.xlane.xlu1 %1242  ;;  %v1282_v60 = vmul.f32 %v2336_v8, %v3069_v51  ;;  %v1281_v30 = vmul.f32 %v2336_v8, %v3067_v59 }
 0x382   : > { %2341 = vrcp.f32 %v1243_v37 }
 0x383   : > { %1412 = vmatprep.mubr.f32.mxu1 %v1282_v60 }
 0x384   : > { %v2338_v17 = vpop.eup %2337  ;;  %1413 = vmatmul.mubr.f32.gmra.mrb[52].mxu1 %v1281_v30 }
 0x385   : > { %v1246_v43 = vpop.xlane.xlu0 %1245  ;;  %v1285_v15 = vmul.f32 %v2338_v17, %v3077_v53  ;;  %v1284_v42 = vmul.f32 %v2338_v17, %v3075_v29 }
 0x386   : > { %2343 = vrcp.f32 %v1246_v43 }
 0x387   : > { %1417 = vmatprep.mubr.f32.mxu1 %v1285_v15 }
 0x388   : > { %v2340_v21 = vpop.eup %2339  ;;  %1418 = vmatmul.mubr.f32.gmra.mrb[54].mxu1 %v1284_v42 }
 0x389   : > { %v1249_v19 = vpop.xlane.xlu1 %1248  ;;  %v1288_v23 = vmul.f32 %v2340_v21, %v3085_v25  ;;  %v1287_v51 = vmul.f32 %v2340_v21, %v3083_v32 }
 0x38a   : > { %2345 = vrcp.f32 %v1249_v19 }
 0x38b   : > { %1422 = vmatprep.mubr.f32.mxu1 %v1288_v23 }
 0x38c   : > { %v2342_v59 = vpop.eup %2341  ;;  %1423 = vmatmul.mubr.f32.gmra.mrb[56].mxu1 %v1287_v51 }
 0x38d   : > { %v1291_v33 = vmul.f32 %v2342_v59, %v3091_v35  ;;  %v1290_v38 = vmul.f32 %v2342_v59, %v3089_v49  ;;  %v2413_v49 = vmov 0.0  }
 0x38e   : > { %2094 = vmatprep.mubr.msk.f32.mxu0 %vm2412_vm5, %v2413_v49 }
 0x38f   : > { %1427 = vmatprep.mubr.f32.mxu1 %v1291_v33 }
 0x390   : > { %v2344_v53 = vpop.eup %2343  ;;  %1428 = vmatmul.mubr.f32.gmra.mrb[58].mxu1 %v1290_v38 }
 0x391   : > { %v1294_v29 = vmul.f32 %v2344_v53, %v3097_v36  ;;  %v1293_v52 = vmul.f32 %v2344_v53, %v3095_v12 }
 0x393   : > { %1432 = vmatprep.mubr.f32.mxu1 %v1294_v29 }
 0x394   : > { %v2346_v20 = vpop.eup %2345  ;;  %1433 = vmatmul.mubr.f32.gmra.mrb[60].mxu1 %v1293_v52 }
 0x395   : > { %v1297_v32 = vmul.f32 %v2346_v20, %v3103_v14  ;;  %v1296_v25 = vmul.f32 %v2346_v20, %v3101_v11 }
 0x397   : > { %1437 = vmatprep.mubr.f32.mxu1 %v1297_v32 }
 0x398   : > { %1438 = vmatmul.mubr.f32.gmra.mrb[62].mxu1 %v1296_v25 }
 0x42f   : > { %v1921_v35 = vpop.f32.mrb[32].mxu1 }
 0x430   : > { %v1922_v41 = vpop.f32.mrb[33].mxu1 }
 0x431   : > { %v1923_v36 = vadd.f32 %v1922_v41, %v1921_v35 }
 0x433   : > { %v1924_v44 = vpop.f32.mrb[34].mxu1  ;;  %v1443_v61 = vmax.f32 %v1923_v36, 0.0 }
 0x434   : > { %v1925_v12 = vpop.f32.mrb[35].mxu1 }
 0x435   : > { %v1926_v46 = vadd.f32 %v1925_v12, %v1924_v44 }
 0x437   : > { %v1444_v24 = vmax.f32 %v1926_v46, 0.0  ;;  %v1927_v47 = vpop.f32.mrb[36].mxu1 }
 0x438   : > { %v1928_v14 = vpop.f32.mrb[37].mxu1 }
 0x439   : > { %v2178_v16 = vpack.c.bf16 %v1444_v24, %v1443_v61  ;;  %v1929_v11 = vadd.f32 %v1928_v14, %v1927_v47 }
 0x43b   : > { %v1930_v31 = vpop.f32.mrb[38].mxu1  ;;  %2180 = vmatpush3.bf16.xpose.msk.msra.mxu0 %vm2743_vm4, %v2178_v16  ;;  %v1445_v2 = vmax.f32 %v1929_v11, 0.0  ;;  %v220_v16 = vld [vmem:[%s3216_s2 + $0x10] sm:$0xff] }
 0x43c   : > { %v1931_v48 = vpop.f32.mrb[39].mxu1  ;;  %2181 = vmatprep.subr.bf16.mxu0 %v2411_v39  ;;  %v1460_v11 = vrot.slane %v220_v16, 1 }
 0x43d   : > { %v1932_v54 = vadd.f32 %v1931_v48, %v1930_v31 }
 0x43f   : > { %v1446_v34 = vmax.f32 %v1932_v54, 0.0  ;;  %v1933_v56 = vpop.f32.mrb[40].mxu1 }
 0x440   : > { %v1934_v3 = vpop.f32.mrb[41].mxu1 }
 0x441   : > { %v2182_v26 = vpack.c.bf16 %v1446_v34, %v1445_v2  ;;  %v1935_v45 = vadd.f32 %v1934_v3, %v1933_v56 }
 0x443   : > { %v1936_v28 = vpop.f32.mrb[42].mxu1  ;;  %2184 = vmatpush3.bf16.xpose.msk.msra.mxu0 %vm2743_vm4, %v2182_v26  ;;  %v1447_v55 = vmax.f32 %v1935_v45, 0.0 }
 0x444   : > { %v1937_v7 = vpop.f32.mrb[43].mxu1  ;;  %2185 = vmatprep.subr.bf16.mxu0 %v2411_v39 }
 0x445   : > { %v1938_v0 = vadd.f32 %v1937_v7, %v1936_v28 }
 0x447   : > { %v1448_v57 = vmax.f32 %v1938_v0, 0.0  ;;  %v1939_v10 = vpop.f32.mrb[44].mxu1 }
 0x448   : > { %v1940_v50 = vpop.f32.mrb[45].mxu1 }
 0x449   : > { %v2186_v63 = vpack.c.bf16 %v1448_v57, %v1447_v55  ;;  %v1941_v13 = vadd.f32 %v1940_v50, %v1939_v10 }
 0x44b   : > { %v1942_v6 = vpop.f32.mrb[46].mxu1  ;;  %2188 = vmatpush3.bf16.xpose.msk.msra.mxu0 %vm2743_vm4, %v2186_v63  ;;  %v1449_v1 = vmax.f32 %v1941_v13, 0.0 }
 0x44c   : > { %v1943_v58 = vpop.f32.mrb[47].mxu1  ;;  %2189 = vmatprep.subr.bf16.mxu0 %v2411_v39 }
 0x44d   : > { %v1944_v4 = vadd.f32 %v1943_v58, %v1942_v6 }
 0x44f   : > { %v1450_v18 = vmax.f32 %v1944_v4, 0.0  ;;  %v1945_v40 = vpop.f32.mrb[48].mxu1 }
 0x450   : > { %v1946_v9 = vpop.f32.mrb[49].mxu1 }
 0x451   : > { %v2190_v22 = vpack.c.bf16 %v1450_v18, %v1449_v1  ;;  %v1947_v27 = vadd.f32 %v1946_v9, %v1945_v40 }
 0x453   : > { %v1948_v5 = vpop.f32.mrb[50].mxu1  ;;  %2192 = vmatpush3.bf16.xpose.msk.msra.mxu0 %vm2743_vm4, %v2190_v22  ;;  %v1451_v60 = vmax.f32 %v1947_v27, 0.0 }
 0x454   : > { %v1949_v8 = vpop.f32.mrb[51].mxu1  ;;  %2193 = vmatprep.subr.bf16.mxu0 %v2411_v39 }
 0x455   : > { %v1950_v37 = vadd.f32 %v1949_v8, %v1948_v5 }
 0x457   : > { %v1452_v30 = vmax.f32 %v1950_v37, 0.0  ;;  %v1951_v17 = vpop.f32.mrb[52].mxu1 }
 0x458   : > { %v1952_v43 = vpop.f32.mrb[53].mxu1 }
 0x459   : > { %v2194_v15 = vpack.c.bf16 %v1452_v30, %v1451_v60  ;;  %v1953_v42 = vadd.f32 %v1952_v43, %v1951_v17 }
 0x45b   : > { %v1954_v21 = vpop.f32.mrb[54].mxu1  ;;  %2196 = vmatpush3.bf16.xpose.msk.msra.mxu0 %vm2743_vm4, %v2194_v15  ;;  %v1453_v51 = vmax.f32 %v1953_v42, 0.0 }
 0x45c   : > { %v1955_v19 = vpop.f32.mrb[55].mxu1  ;;  %2197 = vmatprep.subr.bf16.mxu0 %v2411_v39 }
 0x45d   : > { %v1956_v23 = vadd.f32 %v1955_v19, %v1954_v21 }
 0x45f   : > { %v1454_v59 = vmax.f32 %v1956_v23, 0.0  ;;  %v1957_v33 = vpop.f32.mrb[56].mxu1 }
 0x460   : > { %v1958_v38 = vpop.f32.mrb[57].mxu1 }
 0x461   : > { %v2198_v53 = vpack.c.bf16 %v1454_v59, %v1453_v51  ;;  %v1959_v29 = vadd.f32 %v1958_v38, %v1957_v33 }
 0x463   : > { %v1960_v52 = vpop.f32.mrb[58].mxu1  ;;  %2200 = vmatpush3.bf16.xpose.msk.msra.mxu0 %vm2743_vm4, %v2198_v53  ;;  %v1455_v25 = vmax.f32 %v1959_v29, 0.0 }
 0x464   : > { %v1961_v20 = vpop.f32.mrb[59].mxu1  ;;  %2201 = vmatprep.subr.bf16.mxu0 %v2411_v39 }
 0x465   : > { %v1962_v32 = vadd.f32 %v1961_v20, %v1960_v52 }
 0x467   : > { %v1456_v49 = vmax.f32 %v1962_v32, 0.0  ;;  %v1963_v35 = vpop.f32.mrb[60].mxu1 }
 0x468   : > { %v1964_v41 = vpop.f32.mrb[61].mxu1 }
 0x469   : > { %v2202_v36 = vpack.c.bf16 %v1456_v49, %v1455_v25  ;;  %v1965_v44 = vadd.f32 %v1964_v41, %v1963_v35 }
 0x46b   : > { %v1966_v12 = vpop.f32.mrb[62].mxu1  ;;  %2204 = vmatpush3.bf16.xpose.msk.msra.mxu0 %vm2743_vm4, %v2202_v36  ;;  %v1457_v24 = vmax.f32 %v1965_v44, 0.0 }
 0x46c   : > { %v1967_v46 = vpop.f32.mrb[63].mxu1  ;;  %2205 = vmatprep.subr.bf16.mxu0 %v2411_v39 }
 0x46d   : > { %v1968_v61 = vadd.f32 %v1967_v46, %v1966_v12 }
 0x46f   : > { %v1458_v47 = vmax.f32 %v1968_v61, 0.0 }
 0x471   : > { %v2206_v14 = vpack.c.bf16 %v1458_v47, %v1457_v24 }
 0x473   : > { %2208 = vmatpush3.bf16.xpose.msk.msra.mxu0 %vm2743_vm4, %v2206_v14 }
 0x47a   : > { %2095 = vmatmul.mubr.msk.f32.vlgmr.msra.gmra.mrb[48].mxu0 %vm427_vm1, %v220_v16 }
 0x54d   : > { %v1578_v31 = vpop.f32.mrb[48].mxu0 }
 0x54e   : > { %v1579_v39 = vadd.f32 %v1578_v31, %v1460_v11  ;;  %v2096_v48 = vpop.f32.mrb[49].mxu0 }
 0x550   : > { %1582 = vst [vmem:[%s163_s29] sm:$0x1] %v1579_v39 }
 0x551   : > { %2360 = shalt.err (!%p2357_p3)
}
 0x552   : > { %s2361_s5 = scalar_lea.hbm %s3172_s7, 16  ;;  %s2365_s20 = scalar_lea.hbm %s3217_s3, 32 }
 0x553   : > { %p2362_p4 = scmp.ne.s32.totalorder %s3172_s7, %s2361_s5  ;;  %p2366_p9 = scmp.lt.u32.totalorder %s3172_s7, %s3217_s3 }
 0x554   : > { %p2367_p10 = scmp.lt.u32.totalorder %s2365_s20, %s2361_s5  ;;  %p2369_p12 = scmp.lt.u32.totalorder %s2361_s5, %s3172_s7 }
 0x555   : > { %p2363_p7 = pnand %p2362_p4, %p2470_p5 }
 0x556   : > { %p2368_p11 = por %p2367_p10, %p2366_p9 }
 0x557   : > { %p2364_p8 = pneg %p2363_p7 }
 0x558   : > { %p2370_p13 = por %p2369_p12, %p2368_p11 }
 0x55a   : > { %p2371_p0 = pnand %p2370_p13, %p2364_p8 }
 0x55c   : > { %2374 = shalt.err (!%p2371_p0)
}
 0x55d   : > { %2209 = dma.vmem_to_hbm [thread:$0]  (%p2470_p5), %s3174_s30, 16, %s3172_s7, %s1584_s8  }
 0x55e PF: > { %p2215_p1 = scmp.ge.s32.totalorder %s2409_s15, 2  ;;  %s1608_s27 = sand.u32 1, %s2397_s12  }
 0x55f   : > { %s1609_s28 = scalar_lea.sflag [#allocation3], %s1608_s27 }
 0x560   : > { %p2212_p2 = pnand %p2215_p1, %p2474_p6 }
 0x562   : > { %2392 = dma.done.wait (!%p2212_p2), %s1609_s28, 16  }
 0x563   : > { %2394 = vsyncadd (!%p2212_p2), %s1609_s28, 4294967280  ;;  %p13_p3 = scmp.ge.s32.totalorder %s2458_s18, 4   ;;  %s3222_s12 = smov %s2401_s13 }
 0x564   : > { %s3223_s13 = smov %s2405_s14  ;;  %s3224_s14 = smov %s2468_s21 }
 0x565   : > { %s3225_s15 = smov %s2458_s18  ;;  %15 = sbr.rel (!%p13_p3) target bundleno = 3 (0x3), region = 67 }
 0x56c   :  { %1613 = vsyncpa [#allocation3], 1 }
 0x56d   :  { %1615 = vsyncpa [#allocation3 + $0x1], 1 }

</bundles_post_ra>
